<compile_context>
chip_gen: v5e
topology: v5e:2x2
jax: 0.10.0
libtpu: 0.0.40
codegen_flags: <defaults>
</compile_context>

<pallas_src>
import functools
import math

import jax
import jax.numpy as jnp
from jax.experimental import pallas as pl
from jax.experimental.pallas import tpu as pltpu


def _same_pad_amounts(h, w, kh, kw, sh, sw):
    # exact replica of the PyTorch forward's padding arithmetic
    extra_h = (math.ceil(w / sw) - 1) * sw - w + kw
    extra_v = (math.ceil(h / sh) - 1) * sh - h + kh
    left = extra_h // 2
    right = extra_h - left
    top = extra_v // 2
    bottom = extra_v - top
    return top, bottom, left, right


def _round_up(x, m):
    return ((x + m - 1) // m) * m


def _make_conv_kernel(KH, KW, SH, SW, Cin, HO, WO_PAD, Wq):
    M = HO * WO_PAD

    def kernel(x_ref, w_ref, b_ref, o_ref, p_ref):
        # x_ref: (1, Hq, SH*Wq, SW*Cin)  space-to-depth padded input, one image
        # w_ref: (K, Cout) compute dtype; b_ref: (1, Cout) f32
        # o_ref: (1, M, Cout) f32
        # p_ref: (M, K) VMEM scratch holding the im2col block for this image
        for ki in range(KH):
            dy, py = ki // SH, ki % SH
            for kj in range(KW):
                dx, px = kj // SW, kj % SW
                tap = ki * KW + kj
                patch = x_ref[
                    0,
                    pl.ds(dy, HO),                 # output rows (H phase py)
                    pl.ds(py * Wq + dx, WO_PAD),   # output cols (W phase px)
                    pl.ds(px * Cin, Cin),          # channels of this W phase
                ]                                   # (HO, WO_PAD, Cin)
                # WO_PAD % 8 == 0 -> this reshape is layout-preserving.
                p_ref[:, tap * Cin:(tap + 1) * Cin] = patch.reshape(M, Cin)
        acc = jnp.dot(p_ref[...], w_ref[...], preferred_element_type=jnp.float32)
        o_ref[0] = (acc + b_ref[...]).astype(o_ref.dtype)

    return kernel


@functools.partial(jax.jit, static_argnames=("stride", "compute_dtype"))
def conv2d_static_same_padding(x, weight, bias, *, stride, compute_dtype=jnp.float32):
    """x: (B, Cin, H, W); weight: (Cout, Cin, KH, KW) OIHW; bias: (Cout,) or None.

    Returns NCHW output, identical semantics to Conv2dStaticSamePadding.forward.
    """
    B, Cin, H, W = x.shape
    Cout, Cin_w, KH, KW = weight.shape
    assert Cin_w == Cin  # TODO(synk): groups > 1 not implemented
    SH, SW = stride

    top, bottom, left, right = _same_pad_amounts(H, W, KH, KW, SH, SW)
    assert min(top, bottom, left, right) >= 0, "negative SAME pad (crop) unsupported"

    HO = math.ceil(H / SH)                 # output height
    WO = math.ceil(W / SW)                 # output width
    WO_PAD = _round_up(WO, 8)              # sublane-align so the in-kernel reshape is free
    Hq = HO + (KH - 1) // SH               # padded rows = Hq*SH >= top + H + bottom
    Wq = WO_PAD + (KW - 1) // SW           # padded cols = Wq*SW >= left + W + right
    pad_b = Hq * SH - H - top              # extra zero rows beyond PyTorch's pad: never
    pad_r = Wq * SW - W - left             # read by valid outputs (or multiplied by 0)

    # NCHW -> NHWC (required by the NCHW module interface), pad, space-to-depth.
    # xq[b, hq, py*Wq + wq, px*Cin + ci] = padded[b, hq*SH + py, wq*SW + px, ci]
    x_nhwc = jnp.transpose(x, (0, 2, 3, 1))
    xp = jnp.pad(x_nhwc, ((0, 0), (top, pad_b), (left, pad_r), (0, 0)))
    xq = xp.reshape(B, Hq, SH * Wq, SW * Cin).astype(compute_dtype)

    K = KH * KW * Cin
    M = HO * WO_PAD

    # weight OIHW -> (K, Cout), flatten order (ki, kj, ci) to match the patch columns
    w_mat = jnp.transpose(weight, (2, 3, 1, 0)).reshape(K, Cout).astype(compute_dtype)
    b_vec = bias if bias is not None else jnp.zeros((Cout,), jnp.float32)
    b_mat = b_vec.reshape(1, Cout).astype(jnp.float32)

    kernel = _make_conv_kernel(KH, KW, SH, SW, Cin, HO, WO_PAD, Wq)

    itemsize = jnp.dtype(compute_dtype).itemsize
    bytes_accessed = (B * Hq * SH * Wq * SW * Cin * itemsize   # input read
                      + K * Cout * itemsize + Cout * 4          # weights + bias
                      + B * M * Cout * 4)                       # output write

    out_flat = pl.pallas_call(
        kernel,
        out_shape=jax.ShapeDtypeStruct((B, M, Cout), jnp.float32),
        grid_spec=pltpu.PrefetchScalarGridSpec(
            num_scalar_prefetch=0,
            grid=(B,),
            in_specs=[
                pl.BlockSpec((1, Hq, SH * Wq, SW * Cin), lambda b: (b, 0, 0, 0)),
                pl.BlockSpec((K, Cout), lambda b: (0, 0)),
                pl.BlockSpec((1, Cout), lambda b: (0, 0)),
            ],
            out_specs=pl.BlockSpec((1, M, Cout), lambda b: (b, 0, 0)),
            scratch_shapes=[pltpu.VMEM((M, K), compute_dtype)],
        ),
        compiler_params=pltpu.CompilerParams(
            dimension_semantics=("parallel",),
            vmem_limit_bytes=48 * 1024 * 1024,
        ),
        cost_estimate=pl.CostEstimate(
            flops=2 * B * M * K * Cout,
            transcendentals=0,
            bytes_accessed=bytes_accessed,
        ),
    )(xq, w_mat, b_mat)

    out = out_flat.reshape(B, HO, WO_PAD, Cout)[:, :, :WO, :]   # drop Wo alignment pad
    return jnp.transpose(out, (0, 3, 1, 2))                     # back to NCHW


if __name__ == "__main__":
    # Module config: Conv2dStaticSamePadding(in=4, out=8, kernel_size=3, stride=2, bias=True)
    B, Cin, H, W = 2, 4, 16, 16
    Cout, KH, KW = 8, 3, 3
    stride = (2, 2)

    key = jax.random.PRNGKey(0)
    kx, kw, kb = jax.random.split(key, 3)
    x = jax.random.normal(kx, (B, Cin, H, W), dtype=jnp.float32)
    fan_in = Cin * KH * KW
    weight = jax.random.normal(kw, (Cout, Cin, KH, KW), dtype=jnp.float32) / math.sqrt(fan_in)
    bias = jax.random.normal(kb, (Cout,), dtype=jnp.float32) * 0.1

    top, bottom, left, right = _same_pad_amounts(H, W, KH, KW, stride[0], stride[1])

    def xla_ref(xv, wv, bv):
        r = jax.lax.conv_general_dilated(
            xv, wv, window_strides=stride,
            padding=((top, bottom), (left, right)),
            dimension_numbers=("NCHW", "OIHW", "NCHW"))
        return r + bv[None, :, None, None]

    # exact f32 path (matches the PyTorch module bit-for-bit up to f32 accumulation order)
    out_f32 = jax.block_until_ready(
        conv2d_static_same_padding(x, weight, bias, stride=stride, compute_dtype=jnp.float32))
    ref_f32 = jax.block_until_ready(xla_ref(x, weight, bias))
    assert out_f32.shape == ref_f32.shape == (B, Cout, math.ceil(H / stride[0]), math.ceil(W / stride[1]))
    assert jnp.allclose(out_f32, ref_f32, atol=1e-4, rtol=1e-4), "f32 mismatch vs XLA conv reference"

    # bf16-operand path (MXU-native on v5e/v6e/v7x), f32 accumulation in the kernel
    out_bf16 = jax.block_until_ready(
        conv2d_static_same_padding(x, weight, bias, stride=stride, compute_dtype=jnp.bfloat16))
    ref_bf16 = jax.block_until_ready(
        xla_ref(x.astype(jnp.bfloat16).astype(jnp.float32),
                weight.astype(jnp.bfloat16).astype(jnp.float32), bias))
    assert out_bf16.shape == ref_f32.shape
    assert jnp.allclose(out_bf16, ref_bf16, atol=2e-2, rtol=2e-2), "bf16 mismatch vs bf16-cast reference"

    print("KERNEL_OK")
</pallas_src>

<mosaic_0001>
module attributes {stable_mosaic.version = 11 : i64} {
  func.func @kernel(%arg0: i32, %arg1: memref<1x9x18x8xf32, #tpu.memory_space<vmem>>, %arg2: memref<36x8xf32, #tpu.memory_space<vmem>>, %arg3: memref<1x8xf32, #tpu.memory_space<vmem>>, %arg4: memref<1x64x8xf32, #tpu.memory_space<vmem>>, %arg5: memref<64x36xf32, #tpu.memory_space<vmem>>) attributes {dimension_semantics = [#tpu.dimension_semantics<parallel>], iteration_bounds = array<i64: 2>, scalar_prefetch = 0 : i64, scratch_operands = 1 : i64, tpu.core_type = #tpu.core_type<tc>, window_params = [{transform_indices = @transform_0, window_bounds = array<i64: 1, 9, 18, 8>}, {pipeline_mode = #tpu.pipeline_mode<synchronous>, transform_indices = @transform_1, window_bounds = array<i64: 36, 8>}, {pipeline_mode = #tpu.pipeline_mode<synchronous>, transform_indices = @transform_2, window_bounds = array<i64: 1, 8>}, {transform_indices = @transform_3, window_bounds = array<i64: 1, 64, 8>}]} {
    %c0 = arith.constant 0 : index
    %c0_0 = arith.constant 0 : index
    %c0_1 = arith.constant 0 : index
    %c0_2 = arith.constant 0 : index
    %0 = vector.load %arg1[%c0, %c0_0, %c0_1, %c0_2] : memref<1x9x18x8xf32, #tpu.memory_space<vmem>>, vector<1x8x8x4xf32>
    %1 = vector.shape_cast %0 : vector<1x8x8x4xf32> to vector<8x8x4xf32>
    %2 = vector.shape_cast %1 : vector<8x8x4xf32> to vector<64x4xf32>
    %c0_3 = arith.constant 0 : index
    %c0_4 = arith.constant 0 : index
    %3 = vector.load %arg5[%c0_3, %c0_4] : memref<64x36xf32, #tpu.memory_space<vmem>>, vector<64x4xf32>
    tpu.vector_store %arg5[%c0_3, %c0_4], %2 {strides = array<i32>} : memref<64x36xf32, #tpu.memory_space<vmem>>, vector<64x4xf32>,
    %c0_5 = arith.constant 0 : index
    %c0_6 = arith.constant 0 : index
    %c0_7 = arith.constant 0 : index
    %c4 = arith.constant 4 : index
    %4 = vector.load %arg1[%c0_5, %c0_6, %c0_7, %c4] : memref<1x9x18x8xf32, #tpu.memory_space<vmem>>, vector<1x8x8x4xf32>
    %5 = vector.shape_cast %4 : vector<1x8x8x4xf32> to vector<8x8x4xf32>
    %6 = vector.shape_cast %5 : vector<8x8x4xf32> to vector<64x4xf32>
    %c0_8 = arith.constant 0 : index
    %c4_9 = arith.constant 4 : index
    %7 = vector.load %arg5[%c0_8, %c4_9] : memref<64x36xf32, #tpu.memory_space<vmem>>, vector<64x4xf32>
    tpu.vector_store %arg5[%c0_8, %c4_9], %6 {strides = array<i32>} : memref<64x36xf32, #tpu.memory_space<vmem>>, vector<64x4xf32>,
    %c0_10 = arith.constant 0 : index
    %c0_11 = arith.constant 0 : index
    %c1 = arith.constant 1 : index
    %c0_12 = arith.constant 0 : index
    %8 = vector.load %arg1[%c0_10, %c0_11, %c1, %c0_12] : memref<1x9x18x8xf32, #tpu.memory_space<vmem>>, vector<1x8x8x4xf32>
    %9 = vector.shape_cast %8 : vector<1x8x8x4xf32> to vector<8x8x4xf32>
    %10 = vector.shape_cast %9 : vector<8x8x4xf32> to vector<64x4xf32>
    %c0_13 = arith.constant 0 : index
    %c8 = arith.constant 8 : index
    %11 = vector.load %arg5[%c0_13, %c8] : memref<64x36xf32, #tpu.memory_space<vmem>>, vector<64x4xf32>
    tpu.vector_store %arg5[%c0_13, %c8], %10 {strides = array<i32>} : memref<64x36xf32, #tpu.memory_space<vmem>>, vector<64x4xf32>,
    %c0_14 = arith.constant 0 : index
    %c0_15 = arith.constant 0 : index
    %c9 = arith.constant 9 : index
    %c0_16 = arith.constant 0 : index
    %12 = vector.load %arg1[%c0_14, %c0_15, %c9, %c0_16] : memref<1x9x18x8xf32, #tpu.memory_space<vmem>>, vector<1x8x8x4xf32>
    %13 = vector.shape_cast %12 : vector<1x8x8x4xf32> to vector<8x8x4xf32>
    %14 = vector.shape_cast %13 : vector<8x8x4xf32> to vector<64x4xf32>
    %c0_17 = arith.constant 0 : index
    %c12 = arith.constant 12 : index
    %15 = vector.load %arg5[%c0_17, %c12] : memref<64x36xf32, #tpu.memory_space<vmem>>, vector<64x4xf32>
    tpu.vector_store %arg5[%c0_17, %c12], %14 {strides = array<i32>} : memref<64x36xf32, #tpu.memory_space<vmem>>, vector<64x4xf32>,
    %c0_18 = arith.constant 0 : index
    %c0_19 = arith.constant 0 : index
    %c9_20 = arith.constant 9 : index
    %c4_21 = arith.constant 4 : index
    %16 = vector.load %arg1[%c0_18, %c0_19, %c9_20, %c4_21] : memref<1x9x18x8xf32, #tpu.memory_space<vmem>>, vector<1x8x8x4xf32>
    %17 = vector.shape_cast %16 : vector<1x8x8x4xf32> to vector<8x8x4xf32>
    %18 = vector.shape_cast %17 : vector<8x8x4xf32> to vector<64x4xf32>
    %c0_22 = arith.constant 0 : index
    %c16 = arith.constant 16 : index
    %19 = vector.load %arg5[%c0_22, %c16] : memref<64x36xf32, #tpu.memory_space<vmem>>, vector<64x4xf32>
    tpu.vector_store %arg5[%c0_22, %c16], %18 {strides = array<i32>} : memref<64x36xf32, #tpu.memory_space<vmem>>, vector<64x4xf32>,
    %c0_23 = arith.constant 0 : index
    %c0_24 = arith.constant 0 : index
    %c10 = arith.constant 10 : index
    %c0_25 = arith.constant 0 : index
    %20 = vector.load %arg1[%c0_23, %c0_24, %c10, %c0_25] : memref<1x9x18x8xf32, #tpu.memory_space<vmem>>, vector<1x8x8x4xf32>
    %21 = vector.shape_cast %20 : vector<1x8x8x4xf32> to vector<8x8x4xf32>
    %22 = vector.shape_cast %21 : vector<8x8x4xf32> to vector<64x4xf32>
    %c0_26 = arith.constant 0 : index
    %c20 = arith.constant 20 : index
    %23 = vector.load %arg5[%c0_26, %c20] : memref<64x36xf32, #tpu.memory_space<vmem>>, vector<64x4xf32>
    tpu.vector_store %arg5[%c0_26, %c20], %22 {strides = array<i32>} : memref<64x36xf32, #tpu.memory_space<vmem>>, vector<64x4xf32>,
    %c0_27 = arith.constant 0 : index
    %c1_28 = arith.constant 1 : index
    %c0_29 = arith.constant 0 : index
    %c0_30 = arith.constant 0 : index
    %24 = vector.load %arg1[%c0_27, %c1_28, %c0_29, %c0_30] : memref<1x9x18x8xf32, #tpu.memory_space<vmem>>, vector<1x8x8x4xf32>
    %25 = vector.shape_cast %24 : vector<1x8x8x4xf32> to vector<8x8x4xf32>
    %26 = vector.shape_cast %25 : vector<8x8x4xf32> to vector<64x4xf32>
    %c0_31 = arith.constant 0 : index
    %c24 = arith.constant 24 : index
    %27 = vector.load %arg5[%c0_31, %c24] : memref<64x36xf32, #tpu.memory_space<vmem>>, vector<64x4xf32>
    tpu.vector_store %arg5[%c0_31, %c24], %26 {strides = array<i32>} : memref<64x36xf32, #tpu.memory_space<vmem>>, vector<64x4xf32>,
    %c0_32 = arith.constant 0 : index
    %c1_33 = arith.constant 1 : index
    %c0_34 = arith.constant 0 : index
    %c4_35 = arith.constant 4 : index
    %28 = vector.load %arg1[%c0_32, %c1_33, %c0_34, %c4_35] : memref<1x9x18x8xf32, #tpu.memory_space<vmem>>, vector<1x8x8x4xf32>
    %29 = vector.shape_cast %28 : vector<1x8x8x4xf32> to vector<8x8x4xf32>
    %30 = vector.shape_cast %29 : vector<8x8x4xf32> to vector<64x4xf32>
    %c0_36 = arith.constant 0 : index
    %c28 = arith.constant 28 : index
    %31 = vector.load %arg5[%c0_36, %c28] : memref<64x36xf32, #tpu.memory_space<vmem>>, vector<64x4xf32>
    tpu.vector_store %arg5[%c0_36, %c28], %30 {strides = array<i32>} : memref<64x36xf32, #tpu.memory_space<vmem>>, vector<64x4xf32>,
    %c0_37 = arith.constant 0 : index
    %c1_38 = arith.constant 1 : index
    %c1_39 = arith.constant 1 : index
    %c0_40 = arith.constant 0 : index
    %32 = vector.load %arg1[%c0_37, %c1_38, %c1_39, %c0_40] : memref<1x9x18x8xf32, #tpu.memory_space<vmem>>, vector<1x8x8x4xf32>
    %33 = vector.shape_cast %32 : vector<1x8x8x4xf32> to vector<8x8x4xf32>
    %34 = vector.shape_cast %33 : vector<8x8x4xf32> to vector<64x4xf32>
    %c0_41 = arith.constant 0 : index
    %c32 = arith.constant 32 : index
    %35 = vector.load %arg5[%c0_41, %c32] : memref<64x36xf32, #tpu.memory_space<vmem>>, vector<64x4xf32>
    tpu.vector_store %arg5[%c0_41, %c32], %34 {strides = array<i32>} : memref<64x36xf32, #tpu.memory_space<vmem>>, vector<64x4xf32>,
    %c0_42 = arith.constant 0 : index
    %c0_43 = arith.constant 0 : index
    %36 = vector.load %arg5[%c0_42, %c0_43] : memref<64x36xf32, #tpu.memory_space<vmem>>, vector<64x36xf32>
    %c0_44 = arith.constant 0 : index
    %c0_45 = arith.constant 0 : index
    %37 = vector.load %arg2[%c0_44, %c0_45] : memref<36x8xf32, #tpu.memory_space<vmem>>, vector<36x8xf32>
    %cst = arith.constant dense<0.000000e+00> : vector<64x8xf32>
    %38 = tpu.matmul %36, %37, %cst {dimension_numbers = #tpu.dot_dimension_numbers<[1], [0], [0], [1], [0, 0, 1, 1], [], []>} : vector<64x36xf32>, vector<36x8xf32>, vector<64x8xf32> -> vector<64x8xf32>
    %c0_46 = arith.constant 0 : index
    %c0_47 = arith.constant 0 : index
    %39 = vector.load %arg3[%c0_46, %c0_47] : memref<1x8xf32, #tpu.memory_space<vmem>>, vector<1x8xf32>
    %40 = vector.broadcast %39 : vector<1x8xf32> to vector<64x8xf32>
    %41 = arith.addf %38, %40 : vector<64x8xf32>
    %c0_48 = arith.constant 0 : index
    %c0_49 = arith.constant 0 : index
    %c0_50 = arith.constant 0 : index
    %42 = vector.load %arg4[%c0_48, %c0_49, %c0_50] : memref<1x64x8xf32, #tpu.memory_space<vmem>>, vector<1x64x8xf32>
    %43 = vector.shape_cast %42 : vector<1x64x8xf32> to vector<64x8xf32>
    %44 = vector.shape_cast %41 : vector<64x8xf32> to vector<1x64x8xf32>
    tpu.vector_store %arg4[%c0_48, %c0_49, %c0_50], %44 {strides = array<i32>} : memref<1x64x8xf32, #tpu.memory_space<vmem>>, vector<1x64x8xf32>,
    return
  }
  func.func @transform_0(%arg0: i32) -> (i32, i32, i32, i32) {
    %c0_i32 = arith.constant 0 : i32
    %c0_i32_0 = arith.constant 0 : i32
    %c0_i32_1 = arith.constant 0 : i32
    %c0_i32_2 = arith.constant 0 : i32
    return %arg0, %c0_i32, %c0_i32_0, %c0_i32_1 : i32, i32, i32, i32
  }
  func.func @transform_1(%arg0: i32) -> (i32, i32) {
    %c0_i32 = arith.constant 0 : i32
    %c0_i32_0 = arith.constant 0 : i32
    %c0_i32_1 = arith.constant 0 : i32
    return %c0_i32, %c0_i32_0 : i32, i32
  }
  func.func @transform_2(%arg0: i32) -> (i32, i32) {
    %c0_i32 = arith.constant 0 : i32
    %c0_i32_0 = arith.constant 0 : i32
    %c0_i32_1 = arith.constant 0 : i32
    return %c0_i32, %c0_i32_0 : i32, i32
  }
  func.func @transform_3(%arg0: i32) -> (i32, i32, i32) {
    %c0_i32 = arith.constant 0 : i32
    %c0_i32_0 = arith.constant 0 : i32
    %c0_i32_1 = arith.constant 0 : i32
    return %arg0, %c0_i32, %c0_i32_0 : i32, i32, i32
  }
}

</mosaic_0001>

<bundles_post_ra>
// kernel: conv2d_static_same_padding.1
= control target key start
LH: loop header
LB: loop body
LE: loop exit
PB: predicated region body
PF: predicated region fallthrough
CT: control target
= control target key end

     0   :  { %s807_s12 = smov 0   ;;  %s1056_s0 = inlined_call_operand.vmem [shape: f32[2,9,18,8], index: 0, kind: input, shape index: {}]   ;;  %s1057_s1 = inlined_call_operand.vmem [shape: f32[36,8], index: 1, kind: input, shape index: {}]   ;;  %s1058_s2 = inlined_call_operand.vmem [shape: f32[1,8], index: 2, kind: input, shape index: {}]   ;;  %s1059_s3 = inlined_call_operand.vmem [shape: f32[2,64,8], index: 3, kind: output, shape index: {}]  }
   0x1 LB: > { %s700_s13 = sadd.s32 4294967295, %s780_s12   ;;  %p704_p0 = scmp.ge.s32.totalorder %s780_s12, 1  ;;  %s780_s12 = sphi %s807_s12, %s13_s12  }
   0x2   : > { %p137_p1 = scmp.lt.s32.totalorder %s780_s12, 3 }
   0x4   : > { %p138_p2 = pnand %p704_p0, %p137_p1 }
   0x5   : > { %p161_p3 = scmp.lt.s32.totalorder (!%p138_p2), %s700_s13, 1  ;;  %s782_s18 = smov (!%p138_p2), 12  }
   0x6   : > { %141 = sbr.rel (%p138_p2) target bundleno = 413 (0x19d), region = 32  ;;  %s783_s19 = smov (!%p138_p2), 8  }
   0x7   : > { %s784_s20 = smov (!%p138_p2), 20   ;;  %s785_s21 = smov (!%p138_p2), 24  }
   0x8   : > { %s786_s22 = smov (!%p138_p2), 32  }
   0xb   : > { %s1061_s13 = smov (!%p161_p3, %s700_s13), 1  ;;  %vm179_vm0 = vcmask 31744   ;;  %vm196_vm1 = vcmask 64544   ;;  %vm245_vm2 = vcmask 97344   ;;  %vm294_vm3 = vcmask 130144   ;;  %v560_v42 = vld [vmem:[%s1057_s1 + $0x18] sm:$0xff] }
   0xc   : > { %s759_s14 = smul.u32 216, %s1061_s13  ;;  %vm343_vm4 = vcmask 162944   ;;  %v561_v37 = vld [vmem:[%s1057_s1 + $0x20] sm:$0xf]  ;;  %vm591_vm5 = vcmask 1043456   ;;  %v559_v43 = vld [vmem:[%s1057_s1 + $0x10] sm:$0xff] }
   0xd   : > { %745 = vmatpush.msk.msra.mxu2 %vm591_vm5, %v561_v37  ;;  %746 = vmatpush.msk.msra.mxu3 %vm591_vm5, %v561_v37  ;;  %v558_v46 = vld [vmem:[%s1057_s1 + $0x8] sm:$0xff]  ;;  %vm392_vm6 = vcmask 195744   ;;  %v557_v47 = vld [vmem:[%s1057_s1] sm:$0xff]  ;;  %vm442_vm7 = vcmask 228544   ;;  %vm491_vm8 = vcmask 261344   ;;  %vm540_vm9 = vcmask 294144  }
   0xe   : > { %s821_s17 = scalar_lea.vmem %s1056_s0, %s759_s14  ;;  %732 = vmatpush.msk.msra.mxu0 %vm591_vm5, %v561_v37  ;;  %744 = vmatpush.msk.msra.mxu1 %vm591_vm5, %v561_v37  ;;  %vm566_vm10 = vcmask 293888   ;;  %s743_s6 = sshll.u32 %s1061_s13, 6  ;;  %vm636_vm11 = vcmask 64512  }
   0xf   : > { %v258_v0 = vld [vmem:[%s821_s17 + $0x69] sm:$0xff]  ;;  %v825_v1 = vld [vmem:[%s821_s17 + $0x61] sm:$0xff]  ;;  %v260_v2 = vld [vmem:[%s821_s17 + $0x99] sm:$0xff]  ;;  %748 = vmatpush.msra.mxu2 %v560_v42  ;;  %749 = vmatpush.msra.mxu3 %v560_v42  ;;  %s170_s11 = scalar_lea.vmem %s1059_s3, %s743_s6 }
  0x10   : > { %278 = vrot.lane.b32.xlu1 %v258_v0, %s782_s18  ;;  %229 = vrot.lane.b32.xlu0 %v825_v1, %s783_s19  ;;  %v833_v3 = vld [vmem:[%s821_s17 + $0x91] sm:$0xff]  ;;  %v358_v4 = vld [vmem:[%s821_s17 + $0x9a] sm:$0xff] }
  0x11   : > { %327 = vrot.lane.b32.xlu2 %v258_v0, %s782_s18  ;;  %v356_v5 = vld [vmem:[%s821_s17 + $0x6a] sm:$0xff]  ;;  %v720_v6 = vld [vmem:[%s821_s17 + $0x78] sm:$0xff]  ;;  %v205_v9 = vld [vmem:[%s821_s17 + $0x1] sm:$0xff]  ;;  %607 = vmatpush.msra.mxu0 %v560_v42 }
  0x12   : > { %v714_v7 = vld [vmem:[%s821_s17 + $0xa8] sm:$0xff]  ;;  %v850_v8 = vld [vmem:[%s821_s17 + $0x31] sm:$0xff]  ;;  %v210_v10 = vld [vmem:[%s821_s17 + $0x79] sm:$0xff]  ;;  %185 = vst.msk [vmem:[#allocation2 + $0x28] sm:$0xff] %vm179_vm0, %v720_v6  ;;  %747 = vmatpush.msra.mxu1 %v560_v42  ;;  %751 = vmatpush.msra.mxu2 %v559_v43 }
  0x13   : > { %v254_v11 = vld [vmem:[%s821_s17 + $0x9] sm:$0xff]  ;;  %v305_v13 = vld [vmem:[%s821_s17 + $0x39] sm:$0xff]  ;;  %v259_v14 = vld [vmem:[%s821_s17 + $0x81] sm:$0xff]  ;;  %187 = vst.msk [vmem:[#allocation2 + $0x38] sm:$0xff] %vm179_vm0, %v714_v7  ;;  %752 = vmatpush.msra.mxu3 %v559_v43  ;;  %608 = vmatpush.msra.mxu0 %v559_v43 }
  0x14   : > { %v730_v12 = vld [vmem:[%s821_s17 + $0xa9] sm:$0xff]  ;;  %v310_v15 = vld [vmem:[%s821_s17 + $0xb1] sm:$0xff]  ;;  %v354_v16 = vld [vmem:[%s821_s17 + $0x3a] sm:$0xff]  ;;  %204 = vst.msk [vmem:[#allocation2 + $0x38] sm:$0xff] %vm196_vm1, %v714_v7  ;;  %750 = vmatpush.msra.mxu1 %v559_v43  ;;  %754 = vmatpush.msra.mxu2 %v558_v46 }
  0x15   : > { %v352_v17 = vld [vmem:[%s821_s17 + $0xa] sm:$0xff]  ;;  %v708_v18 = vld [vmem:[%s821_s17 + $0x18] sm:$0xff]  ;;  %v357_v21 = vld [vmem:[%s821_s17 + $0x82] sm:$0xff]  ;;  %202 = vst.msk [vmem:[#allocation2 + $0x28] sm:$0xff] %vm196_vm1, %v720_v6  ;;  %755 = vmatpush.msra.mxu3 %v558_v46  ;;  %609 = vmatpush.msra.mxu0 %v558_v46 }
  0x16   : > { %v718_v19 = vld [vmem:[%s821_s17 + $0x48] sm:$0xff]  ;;  %v359_v20 = vld [vmem:[%s821_s17 + $0xb2] sm:$0xff]  ;;  %v887_v22 = vld [vmem:[%s821_s17 + $0x60] sm:$0xff]  ;;  %181 = vst.msk [vmem:[#allocation2 + $0x8] sm:$0xff] %vm179_vm0, %v708_v18  ;;  %757 = vmatpush.msra.mxu2 %v557_v47  ;;  %753 = vmatpush.msra.mxu1 %v558_v46 }
  0x17   : > { %184 = vst.msk [vmem:[#allocation2 + $0x20] sm:$0xff] %vm179_vm0, %v887_v22  ;;  %v713_v23 = vld [vmem:[%s821_s17 + $0x90] sm:$0xff]  ;;  %v723_v24 = vld [vmem:[%s821_s17 + $0xc0] sm:$0xff]  ;;  %758 = vmatpush.msra.mxu3 %v557_v47  ;;  %610 = vmatpush.msra.mxu0 %v557_v47 }
  0x18   : > { %282 = vrot.lane.b32.xlu1 %v260_v2, %s782_s18  ;;  %233 = vrot.lane.b32.xlu0 %v833_v3, %s783_s19  ;;  %201 = vst.msk [vmem:[#allocation2 + $0x20] sm:$0xff] %vm196_vm1, %v887_v22  ;;  %v726_v26 = vld [vmem:[%s821_s17 + $0x49] sm:$0xff]  ;;  %v724_v27 = vld [vmem:[%s821_s17 + $0x19] sm:$0xff] }
  0x19   : > { %331 = vrot.lane.b32.xlu2 %v260_v2, %s782_s18  ;;  %186 = vst.msk [vmem:[#allocation2 + $0x30] sm:$0xff] %vm179_vm0, %v713_v23  ;;  %v915_v29 = vld [vmem:[%s821_s17 + $0x30] sm:$0xff]  ;;  %v731_v31 = vld [vmem:[%s821_s17 + $0xc1] sm:$0xff]  ;;  %756 = vmatpush.msra.mxu1 %v557_v47 }
  0x1a   : > { %203 = vst.msk [vmem:[#allocation2 + $0x30] sm:$0xff] %vm196_vm1, %v713_v23  ;;  %v304_v32 = vld [vmem:[%s821_s17 + $0x21] sm:$0xff]  ;;  %v257_v38 = vld [vmem:[%s821_s17 + $0x51] sm:$0xff] }
  0x1b   : > { %198 = vst.msk [vmem:[#allocation2 + $0x8] sm:$0xff] %vm196_vm1, %v708_v18  ;;  %v171_v33 = vld [vmem:[%s821_s17] sm:$0xff]  ;;  %v355_v44 = vld [vmem:[%s821_s17 + $0x52] sm:$0xff] }
  0x1c   : > { %183 = vst.msk [vmem:[#allocation2 + $0x18] sm:$0xff] %vm179_vm0, %v718_v19  ;;  %v353_v45 = vld [vmem:[%s821_s17 + $0x22] sm:$0xff] }
  0x1d   : > { %200 = vst.msk [vmem:[#allocation2 + $0x18] sm:$0xff] %vm196_vm1, %v718_v19 }
  0x1e   : > { %182 = vst.msk [vmem:[#allocation2 + $0x10] sm:$0xff] %vm179_vm0, %v915_v29 }
  0x1f   : > { %199 = vst.msk [vmem:[#allocation2 + $0x10] sm:$0xff] %vm196_vm1, %v915_v29 }
  0x20   : > { %380 = vrot.lane.b32.xlu1 %v358_v4, %s784_s20  ;;  %376 = vrot.lane.b32.xlu0 %v356_v5, %s784_s20  ;;  %180 = vst.msk [vmem:[#allocation2] sm:$0xff] %vm179_vm0, %v171_v33 }
  0x21   : > { %426 = vrot.lane.b32.xlu2 %v720_v6, %s785_s21  ;;  %197 = vst.msk [vmem:[#allocation2] sm:$0xff] %vm196_vm1, %v171_v33 }
  0x28   : > { %475 = vrot.lane.b32.xlu1 %v720_v6, %s785_s21  ;;  %430 = vrot.lane.b32.xlu0 %v714_v7, %s785_s21 }
  0x29   : > { %479 = vrot.lane.b32.xlu2 %v714_v7, %s785_s21 }
  0x30   : > { %225 = vrot.lane.b32.xlu1 %v850_v8, %s783_s19  ;;  %221 = vrot.lane.b32.xlu0 %v205_v9, %s783_s19 }
  0x31   : > { %524 = vrot.lane.b32.xlu2 %v210_v10, %s786_s22 }
  0x38   : > { %270 = vrot.lane.b32.xlu1 %v254_v11, %s782_s18  ;;  %528 = vrot.lane.b32.xlu0 %v730_v12, %s786_s22 }
  0x39   : > { %274 = vrot.lane.b32.xlu2 %v305_v13, %s782_s18 }
  0x40   : > { %235 = vrot.lane.b32.xlu1 %v730_v12, %s783_s19  ;;  %231 = vrot.lane.b32.xlu0 %v210_v10, %s783_s19 }
  0x41   : > { %319 = vrot.lane.b32.xlu2 %v254_v11, %s782_s18 }
  0x48   : > { %280 = vrot.lane.b32.xlu1 %v259_v14, %s782_s18  ;;  %323 = vrot.lane.b32.xlu0 %v305_v13, %s782_s18 }
  0x49   : > { %284 = vrot.lane.b32.xlu2 %v310_v15, %s782_s18 }
  0x50   : > { %372 = vrot.lane.b32.xlu1 %v354_v16, %s784_s20  ;;  %368 = vrot.lane.b32.xlu0 %v352_v17, %s784_s20 }
  0x51   : > { %329 = vrot.lane.b32.xlu2 %v259_v14, %s782_s18 }
  0x58   : > { %418 = vrot.lane.b32.xlu1 %v708_v18, %s785_s21  ;;  %333 = vrot.lane.b32.xlu0 %v310_v15, %s782_s18 }
  0x59   : > { %422 = vrot.lane.b32.xlu2 %v718_v19, %s785_s21 }
  0x60   : > { %382 = vrot.lane.b32.xlu1 %v359_v20, %s784_s20  ;;  %378 = vrot.lane.b32.xlu0 %v357_v21, %s784_s20 }
  0x61   : > { %467 = vrot.lane.b32.xlu2 %v708_v18, %s785_s21 }
  0x68   : > { %428 = vrot.lane.b32.xlu1 %v713_v23, %s785_s21  ;;  %471 = vrot.lane.b32.xlu0 %v718_v19, %s785_s21 }
  0x69   : > { %432 = vrot.lane.b32.xlu2 %v723_v24, %s785_s21 }
  0x6b   : > { %v328_v25 = vpop.permute.xlu2 %327 }
  0x70   : > { %520 = vrot.lane.b32.xlu1 %v726_v26, %s786_s22  ;;  %516 = vrot.lane.b32.xlu0 %v724_v27, %s786_s22 }
  0x71   : > { %477 = vrot.lane.b32.xlu2 %v713_v23, %s785_s21 }
  0x73   : > { %v332_v28 = vpop.permute.xlu2 %331 }
  0x78   : > { %223 = vrot.lane.b32.xlu1 %v724_v27, %s783_s19  ;;  %481 = vrot.lane.b32.xlu0 %v723_v24, %s785_s21 }
  0x79   : > { %227 = vrot.lane.b32.xlu2 %v726_v26, %s783_s19 }
  0x7b   : > { %v924_v30 = vpop.permute.xlu2 %426 }
  0x80   : > { %530 = vrot.lane.b32.xlu1 %v731_v31, %s786_s22  ;;  %526 = vrot.lane.b32.xlu0 %v833_v3, %s786_s22 }
  0x81   : > { %272 = vrot.lane.b32.xlu2 %v304_v32, %s782_s18 }
  0x82   : > { %v279_v34 = vpop.permute.xlu1 %278  ;;  %v230_v35 = vpop.permute.xlu0 %229 }
  0x83   : > { %250 = vst.msk [vmem:[#allocation2 + $0x20] sm:$0xff] %vm245_vm2, %v230_v35  ;;  %v935_v36 = vpop.permute.xlu2 %479 }
  0x84   : > { %299 = vst.msk [vmem:[#allocation2 + $0x20] sm:$0xff] %vm294_vm3, %v279_v34 }
  0x85   : > { %348 = vst.msk [vmem:[#allocation2 + $0x20] sm:$0xff] %vm343_vm4, %v328_v25 }
  0x88   : > { %321 = vrot.lane.b32.xlu1 %v304_v32, %s782_s18  ;;  %276 = vrot.lane.b32.xlu0 %v257_v38, %s782_s18 }
  0x89   : > { %325 = vrot.lane.b32.xlu2 %v257_v38, %s782_s18 }
  0x8a   : > { %v283_v39 = vpop.permute.xlu1 %282  ;;  %v234_v40 = vpop.permute.xlu0 %233 }
  0x8b   : > { %252 = vst.msk [vmem:[#allocation2 + $0x30] sm:$0xff] %vm245_vm2, %v234_v40  ;;  %v525_v41 = vpop.permute.xlu2 %524 }
  0x8c   : > { %301 = vst.msk [vmem:[#allocation2 + $0x30] sm:$0xff] %vm294_vm3, %v283_v39  ;;  %v773_v39 = vld [vmem:[%s1058_s2] ss:$0 sm:$0xff] }
  0x8d   : > { %350 = vst.msk [vmem:[#allocation2 + $0x30] sm:$0xff] %vm343_vm4, %v332_v28 }
  0x90   : > { %374 = vrot.lane.b32.xlu1 %v355_v44, %s784_s20  ;;  %370 = vrot.lane.b32.xlu0 %v353_v45, %s784_s20 }
  0x91   : > { %420 = vrot.lane.b32.xlu2 %v915_v29, %s785_s21 }
  0x92   : > { %v381_v48 = vpop.permute.xlu1 %380  ;;  %v377_v49 = vpop.permute.xlu0 %376 }
  0x93   : > { %399 = vst.msk [vmem:[#allocation2 + $0x30] sm:$0xff] %vm392_vm6, %v381_v48  ;;  %v275_v50 = vpop.permute.xlu2 %274 }
  0x94   : > { %397 = vst.msk [vmem:[#allocation2 + $0x20] sm:$0xff] %vm392_vm6, %v377_v49 }
  0x95   : > { %447 = vst.msk [vmem:[#allocation2 + $0x20] sm:$0xff] %vm442_vm7, %v924_v30 }
  0x98   : > { %469 = vrot.lane.b32.xlu1 %v915_v29, %s785_s21  ;;  %424 = vrot.lane.b32.xlu0 %v887_v22, %s785_s21 }
  0x99   : > { %473 = vrot.lane.b32.xlu2 %v887_v22, %s785_s21 }
  0x9a   : > { %v476_v51 = vpop.permute.xlu1 %475  ;;  %v431_v52 = vpop.permute.xlu0 %430 }
  0x9b   : > { %496 = vst.msk [vmem:[#allocation2 + $0x20] sm:$0xff] %vm491_vm8, %v476_v51  ;;  %v320_v53 = vpop.permute.xlu2 %319 }
  0x9c   : > { %449 = vst.msk [vmem:[#allocation2 + $0x30] sm:$0xff] %vm442_vm7, %v431_v52 }
  0x9d   : > { %498 = vst.msk [vmem:[#allocation2 + $0x30] sm:$0xff] %vm491_vm8, %v935_v36 }
  0x9e   : > { %545 = vst.msk [vmem:[#allocation2 + $0x20] sm:$0xff] %vm540_vm9, %v525_v41 }
  0xa0   : > { %522 = vrot.lane.b32.xlu1 %v825_v1, %s786_s22  ;;  %518 = vrot.lane.b32.xlu0 %v850_v8, %s786_s22 }
  0xa2   : > { %v226_v54 = vpop.permute.xlu1 %225  ;;  %v222_v55 = vpop.permute.xlu0 %221 }
  0xa3   : > { %248 = vst.msk [vmem:[#allocation2 + $0x10] sm:$0xff] %vm245_vm2, %v226_v54  ;;  %v285_v56 = vpop.permute.xlu2 %284 }
  0xa4   : > { %246 = vst.msk [vmem:[#allocation2] sm:$0xff] %vm245_vm2, %v222_v55 }
  0xa5   : > { %297 = vst.msk [vmem:[#allocation2 + $0x10] sm:$0xff] %vm294_vm3, %v275_v50  ;;  %v553_v57 = vld [vmem:[#allocation2 + $0x20] sm:$0xff] }
  0xa6   : > { %737 = vmatmul.msk.f32.vlgmr.msra.gmra.mxu2 %vm566_vm10, %v553_v57 }
  0xaa   : > { %v271_v58 = vpop.permute.xlu1 %270  ;;  %v529_v59 = vpop.permute.xlu0 %528 }
  0xab   : > { %295 = vst.msk [vmem:[#allocation2] sm:$0xff] %vm294_vm3, %v271_v58  ;;  %v330_v60 = vpop.permute.xlu2 %329 }
  0xac   : > { %547 = vst.msk [vmem:[#allocation2 + $0x30] sm:$0xff] %vm540_vm9, %v529_v59 }
  0xad   : > { %344 = vst.msk [vmem:[#allocation2] sm:$0xff] %vm343_vm4, %v320_v53 }
  0xb2   : > { %v236_v61 = vpop.permute.xlu1 %235  ;;  %v232_v62 = vpop.permute.xlu0 %231 }
  0xb3   : > { %253 = vst.msk [vmem:[#allocation2 + $0x38] sm:$0xff] %vm245_vm2, %v236_v61  ;;  %v555_v63 = vld [vmem:[#allocation2 + $0x30] sm:$0xff]  ;;  %v423_v0 = vpop.permute.xlu2 %422 }
  0xb4   : > { %251 = vst.msk [vmem:[#allocation2 + $0x28] sm:$0xff] %vm245_vm2, %v232_v62  ;;  %739 = vmatmul.msk.f32.vlgmr.msra.gmra.mxu3 %vm566_vm10, %v555_v63 }
  0xb5   : > { %302 = vst.msk [vmem:[#allocation2 + $0x38] sm:$0xff] %vm294_vm3, %v285_v56 }
  0xba   : > { %v281_v1 = vpop.permute.xlu1 %280  ;;  %v324_v2 = vpop.permute.xlu0 %323 }
  0xbb   : > { %300 = vst.msk [vmem:[#allocation2 + $0x28] sm:$0xff] %vm294_vm3, %v281_v1  ;;  %v468_v3 = vpop.permute.xlu2 %467 }
  0xbc   : > { %346 = vst.msk [vmem:[#allocation2 + $0x10] sm:$0xff] %vm343_vm4, %v324_v2 }
  0xbd   : > { %349 = vst.msk [vmem:[#allocation2 + $0x28] sm:$0xff] %vm343_vm4, %v330_v60 }
  0xc2   : > { %v373_v4 = vpop.permute.xlu1 %372  ;;  %v369_v5 = vpop.permute.xlu0 %368 }
  0xc3   : > { %395 = vst.msk [vmem:[#allocation2 + $0x10] sm:$0xff] %vm392_vm6, %v373_v4  ;;  %v433_v6 = vpop.permute.xlu2 %432 }
  0xc4   : > { %393 = vst.msk [vmem:[#allocation2] sm:$0xff] %vm392_vm6, %v369_v5 }
  0xc5   : > { %445 = vst.msk [vmem:[#allocation2 + $0x10] sm:$0xff] %vm442_vm7, %v423_v0 }
  0xca   : > { %v419_v7 = vpop.permute.xlu1 %418  ;;  %v334_v8 = vpop.permute.xlu0 %333 }
  0xcb   : > { %443 = vst.msk [vmem:[#allocation2] sm:$0xff] %vm442_vm7, %v419_v7  ;;  %v478_v9 = vpop.permute.xlu2 %477 }
  0xcc   : > { %351 = vst.msk [vmem:[#allocation2 + $0x38] sm:$0xff] %vm343_vm4, %v334_v8 }
  0xcd   : > { %492 = vst.msk [vmem:[#allocation2] sm:$0xff] %vm491_vm8, %v468_v3 }
  0xd2   : > { %v383_v10 = vpop.permute.xlu1 %382  ;;  %v379_v11 = vpop.permute.xlu0 %378 }
  0xd3   : > { %400 = vst.msk [vmem:[#allocation2 + $0x38] sm:$0xff] %vm392_vm6, %v383_v10  ;;  %v228_v12 = vpop.permute.xlu2 %227 }
  0xd4   : > { %398 = vst.msk [vmem:[#allocation2 + $0x28] sm:$0xff] %vm392_vm6, %v379_v11 }
  0xd5   : > { %450 = vst.msk [vmem:[#allocation2 + $0x38] sm:$0xff] %vm442_vm7, %v433_v6 }
  0xd6   : > { %249 = vst.msk [vmem:[#allocation2 + $0x18] sm:$0xff] %vm245_vm2, %v228_v12 }
  0xda   : > { %v429_v13 = vpop.permute.xlu1 %428  ;;  %v472_v14 = vpop.permute.xlu0 %471 }
  0xdb   : > { %448 = vst.msk [vmem:[#allocation2 + $0x28] sm:$0xff] %vm442_vm7, %v429_v13  ;;  %v273_v17 = vpop.permute.xlu2 %272 }
  0xdc   : > { %494 = vst.msk [vmem:[#allocation2 + $0x10] sm:$0xff] %vm491_vm8, %v472_v14 }
  0xdd   : > { %497 = vst.msk [vmem:[#allocation2 + $0x28] sm:$0xff] %vm491_vm8, %v478_v9 }
  0xe2   : > { %v521_v15 = vpop.permute.xlu1 %520  ;;  %v517_v16 = vpop.permute.xlu0 %516 }
  0xe3   : > { %543 = vst.msk [vmem:[#allocation2 + $0x10] sm:$0xff] %vm540_vm9, %v521_v15  ;;  %v326_v24 = vpop.permute.xlu2 %325 }
  0xe4   : > { %541 = vst.msk [vmem:[#allocation2] sm:$0xff] %vm540_vm9, %v517_v16 }
  0xea   : > { %v224_v18 = vpop.permute.xlu1 %223  ;;  %v482_v19 = vpop.permute.xlu0 %481  ;;  %v551_v20 = vld [vmem:[#allocation2 + $0x10] sm:$0xff] }
  0xeb   : > { %247 = vst.msk [vmem:[#allocation2 + $0x8] sm:$0xff] %vm245_vm2, %v224_v18  ;;  %v549_v21 = vld [vmem:[#allocation2] sm:$0xff]  ;;  %735 = vmatmul.msk.f32.vlgmr.msra.gmra.mxu1 %vm566_vm10, %v551_v20  ;;  %v421_v29 = vpop.permute.xlu2 %420 }
  0xec   : > { %499 = vst.msk [vmem:[#allocation2 + $0x38] sm:$0xff] %vm491_vm8, %v482_v19  ;;  %733 = vmatmul.msk.f32.vlgmr.msra.gmra.mxu0 %vm566_vm10, %v549_v21 }
  0xed   : > { %296 = vst.msk [vmem:[#allocation2 + $0x8] sm:$0xff] %vm294_vm3, %v273_v17 }
  0xf2   : > { %v531_v22 = vpop.permute.xlu1 %530  ;;  %v527_v23 = vpop.permute.xlu0 %526 }
  0xf3   : > { %548 = vst.msk [vmem:[#allocation2 + $0x38] sm:$0xff] %vm540_vm9, %v531_v22  ;;  %v474_v32 = vpop.permute.xlu2 %473 }
  0xf4   : > { %546 = vst.msk [vmem:[#allocation2 + $0x28] sm:$0xff] %vm540_vm9, %v527_v23 }
  0xfa   : > { %v322_v25 = vpop.permute.xlu1 %321  ;;  %v277_v26 = vpop.permute.xlu0 %276  ;;  %v556_v27 = vld [vmem:[#allocation2 + $0x38] sm:$0xff] }
  0xfb   : > { %345 = vst.msk [vmem:[#allocation2 + $0x8] sm:$0xff] %vm343_vm4, %v322_v25  ;;  %v554_v28 = vld [vmem:[#allocation2 + $0x28] sm:$0xff]  ;;  %740 = vmatmul.msk.f32.gmra.mxu3 %vm566_vm10, %v556_v27 }
  0xfc   : > { %298 = vst.msk [vmem:[#allocation2 + $0x18] sm:$0xff] %vm294_vm3, %v277_v26  ;;  %738 = vmatmul.msk.f32.gmra.mxu2 %vm566_vm10, %v554_v28 }
  0xfd   : > { %347 = vst.msk [vmem:[#allocation2 + $0x18] sm:$0xff] %vm343_vm4, %v326_v24 }
 0x102   : > { %v375_v30 = vpop.permute.xlu1 %374  ;;  %v371_v31 = vpop.permute.xlu0 %370 }
 0x103   : > { %396 = vst.msk [vmem:[#allocation2 + $0x18] sm:$0xff] %vm392_vm6, %v375_v30 }
 0x104   : > { %394 = vst.msk [vmem:[#allocation2 + $0x8] sm:$0xff] %vm392_vm6, %v371_v31 }
 0x105   : > { %444 = vst.msk [vmem:[#allocation2 + $0x8] sm:$0xff] %vm442_vm7, %v421_v29 }
 0x10a   : > { %v470_v33 = vpop.permute.xlu1 %469  ;;  %v425_v34 = vpop.permute.xlu0 %424 }
 0x10b   : > { %493 = vst.msk [vmem:[#allocation2 + $0x8] sm:$0xff] %vm491_vm8, %v470_v33 }
 0x10c   : > { %446 = vst.msk [vmem:[#allocation2 + $0x18] sm:$0xff] %vm442_vm7, %v425_v34 }
 0x10d   : > { %495 = vst.msk [vmem:[#allocation2 + $0x18] sm:$0xff] %vm491_vm8, %v474_v32 }
 0x112   : > { %v523_v35 = vpop.permute.xlu1 %522  ;;  %v519_v36 = vpop.permute.xlu0 %518 }
 0x113   : > { %544 = vst.msk [vmem:[#allocation2 + $0x18] sm:$0xff] %vm540_vm9, %v523_v35 }
 0x114   : > { %542 = vst.msk [vmem:[#allocation2 + $0x8] sm:$0xff] %vm540_vm9, %v519_v36 }
 0x11a   : > { %v552_v37 = vld [vmem:[#allocation2 + $0x18] sm:$0xff] }
 0x11b   : > { %v550_v38 = vld [vmem:[#allocation2 + $0x8] sm:$0xff]  ;;  %736 = vmatmul.msk.f32.gmra.mxu1 %vm566_vm10, %v552_v37 }
 0x11c   : > { %734 = vmatmul.msk.f32.gmra.mxu0 %vm566_vm10, %v550_v38 }
 0x129   : > { %v624_v40 = vpop.f32.mrf.mxu2 }
 0x12a   : > { %v625_v41 = vadd.f32 %v773_v39, %v624_v40 }
 0x12c   : > { %641 = vst.msk [vmem:[%s170_s11 + $0x20] sm:$0xff] %vm636_vm11, %v625_v41 }
 0x137   : > { %v630_v42 = vpop.f32.mrf.mxu3 }
 0x138   : > { %v631_v43 = vadd.f32 %v773_v39, %v630_v42 }
 0x13a   : > { %643 = vst.msk [vmem:[%s170_s11 + $0x30] sm:$0xff] %vm636_vm11, %v631_v43 }
 0x168   : > { %v618_v44 = vpop.f32.mrf.mxu1 }
 0x169   : > { %v612_v45 = vpop.f32.mrf.mxu0  ;;  %v619_v46 = vadd.f32 %v773_v39, %v618_v44 }
 0x16a   : > { %v613_v47 = vadd.f32 %v773_v39, %v612_v45 }
 0x16b   : > { %639 = vst.msk [vmem:[%s170_s11 + $0x10] sm:$0xff] %vm636_vm11, %v619_v46 }
 0x16c   : > { %637 = vst.msk [vmem:[%s170_s11] sm:$0xff] %vm636_vm11, %v613_v47 }
 0x17e   : > { %v633_v48 = vpop.f32.mrf.mxu3 }
 0x17f   : > { %v627_v49 = vpop.f32.mrf.mxu2  ;;  %v634_v50 = vadd.f32 %v773_v39, %v633_v48 }
 0x180   : > { %v628_v51 = vadd.f32 %v773_v39, %v627_v49 }
 0x181   : > { %644 = vst.msk [vmem:[%s170_s11 + $0x38] sm:$0xff] %vm636_vm11, %v634_v50 }
 0x182   : > { %642 = vst.msk [vmem:[%s170_s11 + $0x28] sm:$0xff] %vm636_vm11, %v628_v51 }
 0x198   : > { %v621_v52 = vpop.f32.mrf.mxu1 }
 0x199   : > { %v615_v53 = vpop.f32.mrf.mxu0  ;;  %v622_v54 = vadd.f32 %v773_v39, %v621_v52 }
 0x19a   : > { %v616_v55 = vadd.f32 %v773_v39, %v615_v53 }
 0x19b   : > { %640 = vst.msk [vmem:[%s170_s11 + $0x18] sm:$0xff] %vm636_vm11, %v622_v54 }
 0x19c   : > { %638 = vst.msk [vmem:[%s170_s11 + $0x8] sm:$0xff] %vm636_vm11, %v616_v55 }
 0x19d PF: > { %s13_s12 = sadd.s32 1, %s780_s12  }
 0x19e   : > { %p10_p4 = scmp.ge.s32.totalorder %s13_s12, 4  }
 0x1a0   :  { %12 = sbr.rel (!%p10_p4) target bundleno = 1 (0x1), region = 63 }

</bundles_post_ra>
